<compile_context>
chip_gen: v7x
topology: tpu7x:2x2x1
jax: 0.10.0
libtpu: 0.0.40
codegen_flags: <defaults>
</compile_context>

<pallas_src>
import functools

import jax
import jax.numpy as jnp
from jax.experimental import pallas as pl
from jax.experimental.pallas import tpu as pltpu

_LANE = 128
_SUBLANE = 8


def _round_up(x: int, m: int) -> int:
    return ((x + m - 1) // m) * m


def _cdiv(a: int, b: int) -> int:
    return -(-a // b)


def _make_kernel(num_layers: int):
    """Fused MLP kernel: num_layers x (Linear+ReLU) followed by one fused head matmul."""

    def kernel(x_ref, *refs):
        # refs = (w0, b0, ..., w_{L-1}, b_{L-1}, w_heads, b_heads, out_ref)
        out_ref = refs[-1]
        params = refs[:-1]

        h = x_ref[...]  # f32 activation tile (tb, 784)

        # Hidden stack: Linear -> ReLU.  Weights may be bf16 (MXU-native on
        # v6e/v7x); accumulate in f32, biases are f32.
        for i in range(num_layers):
            w = params[2 * i][...]
            b = params[2 * i + 1][...]
            h = jnp.dot(h.astype(w.dtype), w, preferred_element_type=jnp.float32) + b
            h = jnp.maximum(h, 0.0)

        # Fused mean/logvar head: single MXU stream, single lane-dense store.
        w_h = params[2 * num_layers][...]
        b_h = params[2 * num_layers + 1][...]
        out_ref[...] = (
            jnp.dot(h.astype(w_h.dtype), w_h, preferred_element_type=jnp.float32) + b_h
        ).astype(out_ref.dtype)

    return kernel


def _param_spec(shape):
    """Full-block, constant index_map, single-buffered (block never changes)."""
    try:
        return pl.BlockSpec(shape, lambda i: (0, 0), pipeline_mode=pl.Buffered(1))
    except TypeError:  # older JAX without pipeline_mode on BlockSpec
        return pl.BlockSpec(shape, lambda i: (0, 0))


def _vmem_cap_bytes() -> int:
    """Generation-aware VMEM cap (e.g. ~56 MiB usable on v7x, ~112 MiB on v5e/v6e)."""
    try:
        cap = int(pltpu.get_tpu_info().vmem_capacity_bytes)
    except Exception:
        cap = 64 << 20  # conservative: v7x physical VMEM per TensorCore
    return max(16 << 20, cap * 7 // 8)


def _choose_tb(batch: int, block_batch: int) -> int:
    """Balanced batch tile: multiple of 8 sublanes, <= block_batch, avoids
    pathological padding, and yields >= 2 tiles when possible (v7x megacore)."""
    b8 = _round_up(batch, _SUBLANE)
    n_tiles = max(1, _cdiv(batch, block_batch))
    tb = _round_up(_cdiv(batch, n_tiles), _SUBLANE)
    if b8 // tb < 2 and tb >= 2 * _SUBLANE:
        tb = _round_up(_cdiv(tb, 2), _SUBLANE)
    return min(tb, b8)


@functools.partial(
    jax.jit, static_argnames=("num_layers", "n_components", "dim", "block_batch")
)
def gaussian_nn2_forward(x, padded_params, *, num_layers, n_components, dim,
                         block_batch=512):
    """padded_params: flat tuple (w0, b0, ..., w_{L-1}, b_{L-1}, w_heads, b_heads)
    from pad_params(): weights (in, out) with lane-padded out dims (first layer
    keeps raw 784 rows), fused head packed [means | logvar | zero-pad] to 128."""
    batch, in_features = x.shape
    hidden_pad = padded_params[0].shape[1]
    head_pad = padded_params[-2].shape[1]
    mean_dim = n_components * dim

    tb = _choose_tb(batch, block_batch)
    b_pad = _round_up(batch, tb)
    # Only pad the batch axis (cheap, usually 0-7 rows); feature dim stays 784.
    x_p = x if b_pad == batch else jnp.pad(x, ((0, b_pad - batch), (0, 0)))

    grid = (b_pad // tb,)

    x_spec = pl.BlockSpec((tb, in_features), lambda i: (i, 0))
    param_specs = [_param_spec(p.shape) for p in padded_params]
    out_spec = pl.BlockSpec((tb, head_pad), lambda i: (i, 0))

    # VMEM budget: single-buffered resident params + pipelined input/output tiles
    # + live activations, capped to the chip's usable VMEM.
    itemsize = x.dtype.itemsize
    param_bytes = sum(int(p.size) * p.dtype.itemsize for p in padded_params)
    vmem_bytes = (
        param_bytes
        + 2 * tb * in_features * itemsize   # input double-buffer
        + 2 * tb * head_pad * 4             # output double-buffer (f32)
        + 4 * tb * hidden_pad * 4           # live intermediate activations
        + (4 << 20)                         # headroom
    )
    vmem_limit = int(min(max(vmem_bytes, 8 << 20), _vmem_cap_bytes()))

    # Cost hint reflecting the actual DMA'd widths / dtypes.
    kn = ([(in_features, hidden_pad)]
          + [(hidden_pad, hidden_pad)] * (num_layers - 1)
          + [(hidden_pad, head_pad)])
    flops = 2 * b_pad * sum(k * n for k, n in kn)
    bytes_accessed = (b_pad * in_features * itemsize + param_bytes
                      + b_pad * head_pad * 4)

    out = pl.pallas_call(
        _make_kernel(num_layers),
        grid=grid,
        in_specs=[x_spec] + param_specs,
        out_specs=out_spec,
        out_shape=jax.ShapeDtypeStruct((b_pad, head_pad), jnp.float32),
        compiler_params=pltpu.CompilerParams(
            dimension_semantics=("parallel",),   # megacore sharding on v7x
            vmem_limit_bytes=vmem_limit,
        ),
        cost_estimate=pl.CostEstimate(
            flops=flops, transcendentals=0, bytes_accessed=bytes_accessed
        ),
    )(x_p, *padded_params)

    means = out[:batch, :mean_dim].reshape(batch, n_components, dim)
    logvar = out[:batch, mean_dim:2 * mean_dim].reshape(batch, n_components, dim)
    return means, logvar


def init_params(key, in_features, gaussian_size, mean_dim, num_layers):
    """PyTorch nn.Linear default init: U(-1/sqrt(fan_in), +1/sqrt(fan_in)).
    Weights stored (in, out); biases (1, out). Order: fc_layers..., fc_mean, logvar."""
    dims = [(in_features, gaussian_size)]
    dims += [(gaussian_size, gaussian_size)] * (num_layers - 1)
    dims += [(gaussian_size, mean_dim), (gaussian_size, mean_dim)]  # fc_mean, logvar
    params = []
    for fan_in, fan_out in dims:
        key, kw, kb = jax.random.split(key, 3)
        bound = 1.0 / float(fan_in) ** 0.5
        w = jax.random.uniform(kw, (fan_in, fan_out), jnp.float32, -bound, bound)
        b = jax.random.uniform(kb, (1, fan_out), jnp.float32, -bound, bound)
        params.extend([w, b])
    # NOTE: fc0 from the PyTorch module is never used in forward(), so it is omitted.
    return tuple(params)


def pad_params(params, num_layers, weight_dtype=jnp.bfloat16):
    """Pad & fuse params for the kernel.

    * Hidden weights: out dim zero-padded to a 128-lane multiple; the FIRST layer
      keeps its raw 784-row in dim (Mosaic pads K in vregs), later layers pad the
      in dim to match the previous padded out dim.  Padded columns get zero W/b so
      they stay exactly 0 through ReLU.
    * The two heads are fused column-wise into one weight (hidden_pad, head_pad):
      means in lanes [0, mean_dim), logvar in [mean_dim, 2*mean_dim), zero-padded
      to the next 128-lane multiple -> one MXU stream and one output DMA.
    * Weights cast to weight_dtype (bf16 recommended on v6e/v7x; pass jnp.float32
      on v5e / when bit-tight accuracy is required).  Biases stay f32.
    """
    padded = []
    for i in range(num_layers):
        w, b = params[2 * i], params[2 * i + 1]
        rows = w.shape[0] if i == 0 else _round_up(w.shape[0], _LANE)
        cols = _round_up(w.shape[1], _LANE)
        w_p = jnp.pad(w, ((0, rows - w.shape[0]), (0, cols - w.shape[1])))
        b_p = jnp.pad(b, ((0, 0), (0, cols - b.shape[1])))
        padded.extend([w_p.astype(weight_dtype), b_p.astype(jnp.float32)])

    w_mean, b_mean = params[2 * num_layers], params[2 * num_layers + 1]
    w_lv, b_lv = params[2 * num_layers + 2], params[2 * num_layers + 3]
    w_heads = jnp.concatenate([w_mean, w_lv], axis=1)   # (G, 2*mean_dim)
    b_heads = jnp.concatenate([b_mean, b_lv], axis=1)   # (1, 2*mean_dim)
    rows = _round_up(w_heads.shape[0], _LANE)
    cols = _round_up(w_heads.shape[1], _LANE)
    w_heads = jnp.pad(w_heads, ((0, rows - w_heads.shape[0]),
                                (0, cols - w_heads.shape[1])))
    b_heads = jnp.pad(b_heads, ((0, 0), (0, cols - b_heads.shape[1])))
    padded.extend([w_heads.astype(weight_dtype), b_heads.astype(jnp.float32)])
    return tuple(padded)


def gaussian_nn2_reference(x, params, num_layers, n_components, dim):
    """Pure-JAX f32 reference mirroring the PyTorch forward (unpadded params)."""
    h = x
    for i in range(num_layers):
        h = jnp.maximum(h @ params[2 * i] + params[2 * i + 1], 0.0)
    means = h @ params[2 * num_layers] + params[2 * num_layers + 1]
    logvar = h @ params[2 * num_layers + 2] + params[2 * num_layers + 3]
    return (means.reshape(-1, n_components, dim),
            logvar.reshape(-1, n_components, dim))


if __name__ == "__main__":
    # Small shapes consistent with the module (input dim fixed at 784 by the spec).
    num_layers, gaussian_size, n_components, dim = 2, 32, 4, 8
    batch, in_features = 8, 784

    key = jax.random.PRNGKey(0)
    key, kx = jax.random.split(key)
    x = jax.random.normal(kx, (batch, in_features), dtype=jnp.float32)

    params = init_params(key, in_features, gaussian_size, n_components * dim,
                         num_layers)
    # bf16 weights (MXU-native on v6e/v7x, f32 accumulation). Use
    # weight_dtype=jnp.float32 on v5e / when bit-exactness matters.
    padded_params = pad_params(params, num_layers, weight_dtype=jnp.bfloat16)

    means, logvar = gaussian_nn2_forward(
        x, padded_params, num_layers=num_layers, n_components=n_components, dim=dim
    )
    means, logvar = jax.block_until_ready((means, logvar))

    ref_means, ref_logvar = gaussian_nn2_reference(x, params, num_layers,
                                                   n_components, dim)
    assert means.shape == (batch, n_components, dim)
    assert logvar.shape == (batch, n_components, dim)
    # bf16 weights -> loosened tolerance (f32 accumulation keeps error ~<1%).
    assert jnp.allclose(means, ref_means, atol=3e-2, rtol=3e-2), "means mismatch"
    assert jnp.allclose(logvar, ref_logvar, atol=3e-2, rtol=3e-2), "logvar mismatch"

    print("KERNEL_OK")
</pallas_src>

<mosaic_0001>
module attributes {stable_mosaic.version = 11 : i64} {
  func.func @kernel(%arg0: i32, %arg1: memref<8x784xf32, #tpu.memory_space<vmem>>, %arg2: memref<784x128xbf16, #tpu.memory_space<vmem>>, %arg3: memref<1x128xf32, #tpu.memory_space<vmem>>, %arg4: memref<128x128xbf16, #tpu.memory_space<vmem>>, %arg5: memref<1x128xf32, #tpu.memory_space<vmem>>, %arg6: memref<128x128xbf16, #tpu.memory_space<vmem>>, %arg7: memref<1x128xf32, #tpu.memory_space<vmem>>, %arg8: memref<8x128xf32, #tpu.memory_space<vmem>>) attributes {dimension_semantics = [#tpu.dimension_semantics<parallel>], iteration_bounds = array<i64: 1>, scalar_prefetch = 0 : i64, scratch_operands = 0 : i64, tpu.core_type = #tpu.core_type<tc>, window_params = [{transform_indices = @transform_0, window_bounds = array<i64: 8, 784>}, {pipeline_mode = #tpu.pipeline_mode<synchronous>, transform_indices = @transform_1, window_bounds = array<i64: 784, 128>}, {pipeline_mode = #tpu.pipeline_mode<synchronous>, transform_indices = @transform_2, window_bounds = array<i64: 1, 128>}, {pipeline_mode = #tpu.pipeline_mode<synchronous>, transform_indices = @transform_3, window_bounds = array<i64: 128, 128>}, {pipeline_mode = #tpu.pipeline_mode<synchronous>, transform_indices = @transform_4, window_bounds = array<i64: 1, 128>}, {pipeline_mode = #tpu.pipeline_mode<synchronous>, transform_indices = @transform_5, window_bounds = array<i64: 128, 128>}, {pipeline_mode = #tpu.pipeline_mode<synchronous>, transform_indices = @transform_6, window_bounds = array<i64: 1, 128>}, {transform_indices = @transform_7, window_bounds = array<i64: 8, 128>}]} {
    %c0 = arith.constant 0 : index
    %c0_0 = arith.constant 0 : index
    %0 = vector.load %arg1[%c0, %c0_0] : memref<8x784xf32, #tpu.memory_space<vmem>>, vector<8x784xf32>
    %c0_1 = arith.constant 0 : index
    %c0_2 = arith.constant 0 : index
    %1 = vector.load %arg2[%c0_1, %c0_2] : memref<784x128xbf16, #tpu.memory_space<vmem>>, vector<784x128xbf16>
    %c0_3 = arith.constant 0 : index
    %c0_4 = arith.constant 0 : index
    %2 = vector.load %arg3[%c0_3, %c0_4] : memref<1x128xf32, #tpu.memory_space<vmem>>, vector<1x128xf32>
    %3 = arith.truncf %0 : vector<8x784xf32> to vector<8x784xbf16>
    %cst = arith.constant dense<0.000000e+00> : vector<8x128xf32>
    %4 = tpu.matmul %3, %1, %cst {dimension_numbers = #tpu.dot_dimension_numbers<[1], [0], [0], [1], [0, 0, 1, 1], [], []>} : vector<8x784xbf16>, vector<784x128xbf16>, vector<8x128xf32> -> vector<8x128xf32>
    %5 = vector.broadcast %2 : vector<1x128xf32> to vector<8x128xf32>
    %6 = arith.addf %4, %5 : vector<8x128xf32>
    %cst_5 = arith.constant 0.000000e+00 : f32
    %7 = vector.broadcast %cst_5 : f32 to vector<8x128xf32>
    %8 = arith.maximumf %6, %7 : vector<8x128xf32>
    %c0_6 = arith.constant 0 : index
    %c0_7 = arith.constant 0 : index
    %9 = vector.load %arg4[%c0_6, %c0_7] : memref<128x128xbf16, #tpu.memory_space<vmem>>, vector<128x128xbf16>
    %c0_8 = arith.constant 0 : index
    %c0_9 = arith.constant 0 : index
    %10 = vector.load %arg5[%c0_8, %c0_9] : memref<1x128xf32, #tpu.memory_space<vmem>>, vector<1x128xf32>
    %11 = arith.truncf %8 : vector<8x128xf32> to vector<8x128xbf16>
    %cst_10 = arith.constant dense<0.000000e+00> : vector<8x128xf32>
    %12 = tpu.matmul %11, %9, %cst_10 {dimension_numbers = #tpu.dot_dimension_numbers<[1], [0], [0], [1], [0, 0, 1, 1], [], []>} : vector<8x128xbf16>, vector<128x128xbf16>, vector<8x128xf32> -> vector<8x128xf32>
    %13 = vector.broadcast %10 : vector<1x128xf32> to vector<8x128xf32>
    %14 = arith.addf %12, %13 : vector<8x128xf32>
    %cst_11 = arith.constant 0.000000e+00 : f32
    %15 = vector.broadcast %cst_11 : f32 to vector<8x128xf32>
    %16 = arith.maximumf %14, %15 : vector<8x128xf32>
    %c0_12 = arith.constant 0 : index
    %c0_13 = arith.constant 0 : index
    %17 = vector.load %arg6[%c0_12, %c0_13] : memref<128x128xbf16, #tpu.memory_space<vmem>>, vector<128x128xbf16>
    %c0_14 = arith.constant 0 : index
    %c0_15 = arith.constant 0 : index
    %18 = vector.load %arg7[%c0_14, %c0_15] : memref<1x128xf32, #tpu.memory_space<vmem>>, vector<1x128xf32>
    %19 = arith.truncf %16 : vector<8x128xf32> to vector<8x128xbf16>
    %cst_16 = arith.constant dense<0.000000e+00> : vector<8x128xf32>
    %20 = tpu.matmul %19, %17, %cst_16 {dimension_numbers = #tpu.dot_dimension_numbers<[1], [0], [0], [1], [0, 0, 1, 1], [], []>} : vector<8x128xbf16>, vector<128x128xbf16>, vector<8x128xf32> -> vector<8x128xf32>
    %21 = vector.broadcast %18 : vector<1x128xf32> to vector<8x128xf32>
    %22 = arith.addf %20, %21 : vector<8x128xf32>
    %c0_17 = arith.constant 0 : index
    %c0_18 = arith.constant 0 : index
    %23 = vector.load %arg8[%c0_17, %c0_18] : memref<8x128xf32, #tpu.memory_space<vmem>>, vector<8x128xf32>
    tpu.vector_store %arg8[%c0_17, %c0_18], %22 {strides = array<i32>} : memref<8x128xf32, #tpu.memory_space<vmem>>, vector<8x128xf32>,
    return
  }
  func.func @transform_0(%arg0: i32) -> (i32, i32) {
    %c0_i32 = arith.constant 0 : i32
    %c0_i32_0 = arith.constant 0 : i32
    return %arg0, %c0_i32 : i32, i32
  }
  func.func @transform_1(%arg0: i32) -> (i32, i32) {
    %c0_i32 = arith.constant 0 : i32
    %c0_i32_0 = arith.constant 0 : i32
    %c0_i32_1 = arith.constant 0 : i32
    return %c0_i32, %c0_i32_0 : i32, i32
  }
  func.func @transform_2(%arg0: i32) -> (i32, i32) {
    %c0_i32 = arith.constant 0 : i32
    %c0_i32_0 = arith.constant 0 : i32
    %c0_i32_1 = arith.constant 0 : i32
    return %c0_i32, %c0_i32_0 : i32, i32
  }
  func.func @transform_3(%arg0: i32) -> (i32, i32) {
    %c0_i32 = arith.constant 0 : i32
    %c0_i32_0 = arith.constant 0 : i32
    %c0_i32_1 = arith.constant 0 : i32
    return %c0_i32, %c0_i32_0 : i32, i32
  }
  func.func @transform_4(%arg0: i32) -> (i32, i32) {
    %c0_i32 = arith.constant 0 : i32
    %c0_i32_0 = arith.constant 0 : i32
    %c0_i32_1 = arith.constant 0 : i32
    return %c0_i32, %c0_i32_0 : i32, i32
  }
  func.func @transform_5(%arg0: i32) -> (i32, i32) {
    %c0_i32 = arith.constant 0 : i32
    %c0_i32_0 = arith.constant 0 : i32
    %c0_i32_1 = arith.constant 0 : i32
    return %c0_i32, %c0_i32_0 : i32, i32
  }
  func.func @transform_6(%arg0: i32) -> (i32, i32) {
    %c0_i32 = arith.constant 0 : i32
    %c0_i32_0 = arith.constant 0 : i32
    %c0_i32_1 = arith.constant 0 : i32
    return %c0_i32, %c0_i32_0 : i32, i32
  }
  func.func @transform_7(%arg0: i32) -> (i32, i32) {
    %c0_i32 = arith.constant 0 : i32
    %c0_i32_0 = arith.constant 0 : i32
    return %arg0, %c0_i32 : i32, i32
  }
}

</mosaic_0001>

<bundles_post_ra>
// kernel: gaussian_nn2_forward.1
= control target key start
LH: loop header
LB: loop body
LE: loop exit
PB: predicated region body
PF: predicated region fallthrough
CT: control target
= control target key end

     0   :  { %12 = vsyncpa [#allocation3], 0  ;;  %s1399_s0 = inlined_call_operand.hbm [shape: f32[8,784], index: 0, kind: input, shape index: {}]   ;;  %s1400_s1 = inlined_call_operand.hbm [shape: bf16[784,128], index: 1, kind: input, shape index: {}]   ;;  %s1401_s2 = inlined_call_operand.vmem [shape: f32[1,128], index: 2, kind: input, shape index: {}]   ;;  %s1402_s3 = inlined_call_operand.hbm [shape: bf16[128,128], index: 3, kind: input, shape index: {}]   ;;  %s1403_s4 = inlined_call_operand.vmem [shape: f32[1,128], index: 4, kind: input, shape index: {}]   ;;  %s1404_s5 = inlined_call_operand.hbm [shape: bf16[128,128], index: 5, kind: input, shape index: {}]   ;;  %s1405_s6 = inlined_call_operand.vmem [shape: f32[1,128], index: 6, kind: input, shape index: {}]   ;;  %s1406_s7 = inlined_call_operand.vmem [shape: f32[8,128], index: 7, kind: output, shape index: {}]  }
   0x1   :  { %13 = vsyncpa [#allocation5], 0 }
   0x2   :  { %14 = vsyncpa [#allocation8], 0  ;;  %s1259_s24 = smov [#allocation4]   ;;  %s1165_s28 = scalar_lea.hbm %s1400_s1, 6272 }
   0x3   :  { %s30_s25 = sshll.u32 %s1259_s24, 4  ;;  %p1166_p0 = scmp.ne.s32.totalorder %s1400_s1, %s1165_s28  ;;  %s31_s25 = int_to_ptr.vmem [resolvable:$true] %s30_s25 }
   0x4   :  { %p1169_p1 = scmp.lt.u32.totalorder %s1165_s28, %s1400_s1 }
   0x6   :  { %p1171_p2 = pnand %p1169_p1, %p1166_p0 }
   0x8   :  { %1174 = shalt.err (!%p1171_p2)
}
   0x9   :  { %s1175_s10 = scalar_lea.vmem %s31_s25, 6272  ;;  %p1180_p4 = scmp.lt.s32.totalorder %s31_s25, %s31_s25 }
   0xa   :  { %p1176_p3 = scmp.ne.s32.totalorder %s31_s25, %s1175_s10  ;;  %p1181_p5 = scmp.lt.s32.totalorder %s1175_s10, %s1175_s10 }
   0xc   :  { %p1182_p6 = por %p1181_p5, %p1180_p4 }
   0xe   :  { %p1183_p7 = pnand %p1182_p6, %p1176_p3 }
  0x10   :  { %1186 = shalt.err (!%p1183_p7)
}
  0x11   :  { %s1260_s11 = smov 64   ;;  %s1261_s12 = smov 4  }
  0x12   :  { %36 = dma.hbm_to_vmem [thread:$0]  %s1400_s1, 6272, %s31_s25, [#allocation5], %s1260_s11, %s1260_s11, %s1261_s12  }
  0x13   :  { %s1262_s15 = smov [#allocation2]   ;;  %s1263_s17 = smov [#allocation6]  }
  0x14   :  { %s21_s16 = sshll.u32 %s1262_s15, 4  ;;  %s44_s18 = sshll.u32 %s1263_s17, 4  ;;  %s22_s16 = int_to_ptr.vmem [resolvable:$true] %s21_s16  ;;  %s45_s18 = int_to_ptr.vmem [resolvable:$true] %s44_s18 }
  0x15   :  { %s1187_s21 = scalar_lea.hbm %s1399_s0, 896 }
  0x16   :  { %p1188_p8 = scmp.ne.s32.totalorder %s1399_s0, %s1187_s21  ;;  %p1191_p9 = scmp.lt.u32.totalorder %s1187_s21, %s1399_s0 }
  0x18   :  { %p1193_p10 = pnand %p1191_p9, %p1188_p8 }
  0x1a   :  { %1196 = shalt.err (!%p1193_p10)
}
  0x1b   :  { %s1197_s1 = scalar_lea.vmem %s22_s16, 896  ;;  %p1202_p12 = scmp.lt.s32.totalorder %s22_s16, %s22_s16 }
  0x1c   :  { %p1198_p11 = scmp.ne.s32.totalorder %s22_s16, %s1197_s1  ;;  %p1203_p13 = scmp.lt.s32.totalorder %s1197_s1, %s1197_s1 }
  0x1e   :  { %p1204_p0 = por %p1203_p13, %p1202_p12 }
  0x20   :  { %p1205_p1 = pnand %p1204_p0, %p1198_p11 }
  0x22   :  { %1208 = shalt.err (!%p1205_p1)
}
  0x23   :  { %24 = dma.hbm_to_vmem [thread:$0]  %s1399_s0, 896, %s22_s16, [#allocation3]  }
  0x24   :  { %s1209_s30 = scalar_lea.hbm %s1402_s3, 1024 }
  0x25   :  { %p1210_p2 = scmp.ne.s32.totalorder %s1402_s3, %s1209_s30  ;;  %p1213_p3 = scmp.lt.u32.totalorder %s1209_s30, %s1402_s3 }
  0x27   :  { %p1215_p4 = pnand %p1213_p3, %p1210_p2 }
  0x29   :  { %1218 = shalt.err (!%p1215_p4)
}
  0x2a   :  { %s1219_s14 = scalar_lea.vmem %s45_s18, 1024  ;;  %p1224_p6 = scmp.lt.s32.totalorder %s45_s18, %s45_s18 }
  0x2b   :  { %p1220_p5 = scmp.ne.s32.totalorder %s45_s18, %s1219_s14  ;;  %p1225_p7 = scmp.lt.s32.totalorder %s1219_s14, %s1219_s14 }
  0x2d   :  { %p1226_p8 = por %p1225_p7, %p1224_p6 }
  0x2f   :  { %p1227_p9 = pnand %p1226_p8, %p1220_p5 }
  0x31   :  { %1230 = shalt.err (!%p1227_p9)
}
  0x32   :  { %50 = dma.hbm_to_vmem [thread:$0]  %s1402_s3, 1024, %s45_s18, [#allocation5], %s1260_s11, %s1260_s11, %s1261_s12  }
  0x33   :  { %s1264_s16 = smov [#allocation7]   ;;  %s1231_s21 = scalar_lea.hbm %s1404_s5, 1024 }
  0x34   :  { %s58_s17 = sshll.u32 %s1264_s16, 4  ;;  %p1232_p10 = scmp.ne.s32.totalorder %s1404_s5, %s1231_s21  ;;  %s59_s17 = int_to_ptr.vmem [resolvable:$true] %s58_s17 }
  0x35   :  { %p1235_p11 = scmp.lt.u32.totalorder %s1231_s21, %s1404_s5 }
  0x37   :  { %p1237_p12 = pnand %p1235_p11, %p1232_p10 }
  0x39   :  { %1240 = shalt.err (!%p1237_p12)
}
  0x3a   :  { %s1241_s1 = scalar_lea.vmem %s59_s17, 1024  ;;  %p1246_p0 = scmp.lt.s32.totalorder %s59_s17, %s59_s17 }
  0x3b   :  { %p1242_p13 = scmp.ne.s32.totalorder %s59_s17, %s1241_s1  ;;  %p1247_p1 = scmp.lt.s32.totalorder %s1241_s1, %s1241_s1 }
  0x3d   :  { %p1248_p2 = por %p1247_p1, %p1246_p0 }
  0x3f   :  { %p1249_p3 = pnand %p1248_p2, %p1242_p13 }
  0x41   :  { %1252 = shalt.err (!%p1249_p3)
}
  0x42   :  { %64 = dma.hbm_to_vmem [thread:$0]  %s1404_s5, 1024, %s59_s17, [#allocation8], %s1260_s11, %s1260_s11, %s1261_s12  }
  0x43   :  { %1253 = dma.done.wait [#allocation3], 896  }
  0x44   :  { %1254 = vsyncadd [#allocation3], 4294966400 }
  0x45   :  { %1255 = dma.done.wait [#allocation5], 7296  }
  0x46   :  { %1256 = vsyncadd [#allocation5], 4294960000 }
  0x47   :  { %1257 = dma.done.wait [#allocation8], 1024  }
  0x48   :  { %1258 = vsyncadd [#allocation8], 4294966272  ;;  %v1100_v0 = vld [vmem:[#allocation4 + $0x40] sm:$0xff]   ;;  %v1104_v4 = vld [vmem:[#allocation4 + $0x48] sm:$0xff]   ;;  %v1265_v44 = vmov 0.0   ;;  %vm1266_vm0 = vmmov 0  }
  0x49   :  { %v1101_v1 = vld [vmem:[#allocation4] sm:$0xff]   ;;  %960 = vmatprep.subr.bf16.mxu0 %v1100_v0  ;;  %v1105_v5 = vld [vmem:[#allocation4 + $0x8] sm:$0xff]   ;;  %v1108_v8 = vld [vmem:[#allocation4 + $0x50] sm:$0xff]   ;;  %vm493_vm1 = vcmask 130048  }
  0x4a   :  { %v1102_v2 = vld [vmem:[#allocation4 + $0xc0] sm:$0xff]   ;;  %961 = vmatpush3.bf16.msra.mxu0 %v1101_v1  ;;  %v1106_v6 = vld [vmem:[#allocation4 + $0xc8] sm:$0xff]   ;;  %v1109_v9 = vld [vmem:[#allocation4 + $0x10] sm:$0xff]  }
  0x4b   :  { %v1103_v3 = vld [vmem:[#allocation4 + $0x80] sm:$0xff]   ;;  %982 = vmatprep.subr.bf16.mxu1 %v1102_v2  ;;  %962 = vmatprep.subr.bf16.mxu0 %v1104_v4  ;;  %v1107_v7 = vld [vmem:[#allocation4 + $0x88] sm:$0xff]   ;;  %v1110_v10 = vld [vmem:[#allocation4 + $0xd0] sm:$0xff]  }
  0x4c   :  { %983 = vmatpush3.bf16.msra.mxu1 %v1103_v3  ;;  %v1111_v11 = vld [vmem:[#allocation4 + $0x90] sm:$0xff]   ;;  %v1112_v12 = vld [vmem:[#allocation4 + $0x58] sm:$0xff]   ;;  %v1116_v16 = vld [vmem:[#allocation4 + $0x60] sm:$0xff]  }
  0x4d   :  { %984 = vmatprep.subr.bf16.mxu1 %v1106_v6  ;;  %v1113_v13 = vld [vmem:[#allocation4 + $0x18] sm:$0xff]   ;;  %v1117_v17 = vld [vmem:[#allocation4 + $0x20] sm:$0xff]   ;;  %v1120_v20 = vld [vmem:[#allocation4 + $0x68] sm:$0xff]  }
  0x4e   :  { %963 = vmatpush3.bf16.msra.mxu0 %v1105_v5  ;;  %v1114_v14 = vld [vmem:[#allocation4 + $0xd8] sm:$0xff]   ;;  %v1118_v18 = vld [vmem:[#allocation4 + $0xe0] sm:$0xff]   ;;  %v1121_v21 = vld [vmem:[#allocation4 + $0x28] sm:$0xff]  }
  0x4f   :  { %964 = vmatprep.subr.bf16.mxu0 %v1108_v8  ;;  %v1115_v15 = vld [vmem:[#allocation4 + $0x98] sm:$0xff]   ;;  %v1119_v19 = vld [vmem:[#allocation4 + $0xa0] sm:$0xff]   ;;  %v1122_v22 = vld [vmem:[#allocation4 + $0xe8] sm:$0xff]  }
  0x50   :  { %985 = vmatpush3.bf16.msra.mxu1 %v1107_v7  ;;  %v1123_v23 = vld [vmem:[#allocation4 + $0xa8] sm:$0xff]   ;;  %v1124_v24 = vld [vmem:[#allocation4 + $0x70] sm:$0xff]   ;;  %v1128_v28 = vld [vmem:[#allocation4 + $0x78] sm:$0xff]  }
  0x51   :  { %986 = vmatprep.subr.bf16.mxu1 %v1110_v10  ;;  %v1125_v25 = vld [vmem:[#allocation4 + $0x30] sm:$0xff]   ;;  %v1129_v29 = vld [vmem:[#allocation4 + $0x38] sm:$0xff]   ;;  %v80_v34 = vld [vmem:[#allocation2] sm:$0xff] }
  0x52   :  { %965 = vmatpush3.bf16.msra.mxu0 %v1109_v9  ;;  %v1126_v26 = vld [vmem:[#allocation4 + $0xf0] sm:$0xff]   ;;  %v1130_v30 = vld [vmem:[#allocation4 + $0xf8] sm:$0xff]   ;;  %v186_v35 = vpack.c.bf16 %v80_v34, %v80_v34  ;;  %v1132_v36 = vld [vmem:[#allocation4 + $0x140] sm:$0xff]  }
  0x53   :  { %966 = vmatprep.subr.bf16.mxu0 %v1112_v12  ;;  %v1127_v27 = vld [vmem:[#allocation4 + $0xb0] sm:$0xff]   ;;  %v1131_v33 = vld [vmem:[#allocation4 + $0xb8] sm:$0xff]   ;;  %v83_v37 = vld [vmem:[#allocation2 + $0x18] sm:$0xff] }
  0x54   :  { %987 = vmatpush3.bf16.msra.mxu1 %v1111_v11  ;;  %v81_v31 = vld [vmem:[#allocation2 + $0x8] sm:$0xff]  ;;  %v189_v38 = vpack.c.bf16 %v83_v37, %v83_v37  ;;  %v1133_v39 = vld [vmem:[#allocation4 + $0x100] sm:$0xff]   ;;  %v82_v40 = vld [vmem:[#allocation2 + $0x10] sm:$0xff] }
  0x55   :  { %988 = vmatprep.subr.bf16.mxu1 %v1114_v14  ;;  %v187_v32 = vpack.c.bf16 %v81_v31, %v81_v31  ;;  %v188_v41 = vpack.c.bf16 %v82_v40, %v82_v40  ;;  %v1134_v42 = vld [vmem:[#allocation4 + $0x148] sm:$0xff]   ;;  %v1136_v45 = vld [vmem:[#allocation4 + $0x150] sm:$0xff]   ;;  %v1138_v47 = vld [vmem:[#allocation4 + $0x158] sm:$0xff]  }
  0x56   :  { %967 = vmatpush3.bf16.msra.mxu0 %v1113_v13  ;;  %569 = vmatprep.mubr.bf16.mxu1 %v189_v38  ;;  %v1135_v43 = vld [vmem:[#allocation4 + $0x108] sm:$0xff]   ;;  %v1137_v46 = vld [vmem:[#allocation4 + $0x110] sm:$0xff]   ;;  %v1139_v48 = vld [vmem:[#allocation4 + $0x118] sm:$0xff]  }
  0x57   :  { %968 = vmatprep.subr.bf16.mxu0 %v1116_v16  ;;  %529 = vmatprep.mubr.bf16.mxu0 %v187_v32  ;;  %v1140_v49 = vld [vmem:[#allocation4 + $0x160] sm:$0xff]   ;;  %v1142_v51 = vld [vmem:[#allocation4 + $0x168] sm:$0xff]   ;;  %v85_v54 = vld [vmem:[#allocation2 + $0x28] sm:$0xff] }
  0x58   :  { %989 = vmatpush3.bf16.msra.mxu1 %v1115_v15  ;;  %v1141_v50 = vld [vmem:[#allocation4 + $0x120] sm:$0xff]   ;;  %v1143_v52 = vld [vmem:[#allocation4 + $0x128] sm:$0xff]   ;;  %v1144_v55 = vld [vmem:[#allocation4 + $0x170] sm:$0xff]   ;;  %v191_v56 = vpack.c.bf16 %v85_v54, %v85_v54 }
  0x59   :  { %990 = vmatprep.subr.bf16.mxu1 %v1118_v18  ;;  %v1148_v53 = vld [vmem:[#allocation4 + $0x180] sm:$0xff]   ;;  %v86_v57 = vld [vmem:[#allocation2 + $0x30] sm:$0xff]  ;;  %v1145_v59 = vld [vmem:[#allocation4 + $0x130] sm:$0xff]  }
  0x5a   :  { %969 = vmatpush3.bf16.msra.mxu0 %v1117_v17  ;;  %v192_v58 = vpack.c.bf16 %v86_v57, %v86_v57  ;;  %v1146_v60 = vld [vmem:[#allocation4 + $0x178] sm:$0xff]   ;;  %v84_v62 = vld [vmem:[#allocation2 + $0x20] sm:$0xff]  ;;  %v1150_v1 = vld [vmem:[#allocation6 + $0x8] sm:$0xff]  }
  0x5b   :  { %970 = vmatprep.subr.bf16.mxu0 %v1120_v20  ;;  %v1147_v61 = vld [vmem:[#allocation4 + $0x138] sm:$0xff]   ;;  %v190_v63 = vpack.c.bf16 %v84_v62, %v84_v62  ;;  %v1149_v0 = vld [vmem:[#allocation6] sm:$0xff]   ;;  %v1152_v3 = vld [vmem:[#allocation6 + $0x18] sm:$0xff]  }
  0x5c   :  { %991 = vmatpush3.bf16.msra.mxu1 %v1119_v19  ;;  %v1151_v2 = vld [vmem:[#allocation6 + $0x10] sm:$0xff]   ;;  %v1153_v4 = vld [vmem:[#allocation6 + $0x20] sm:$0xff]   ;;  %v1154_v5 = vld [vmem:[#allocation6 + $0x28] sm:$0xff]  }
  0x5d   :  { %992 = vmatprep.subr.bf16.mxu1 %v1122_v22  ;;  %v1155_v6 = vld [vmem:[#allocation6 + $0x30] sm:$0xff]   ;;  %v1156_v7 = vld [vmem:[#allocation6 + $0x38] sm:$0xff]   ;;  %v1157_v8 = vld [vmem:[#allocation7] sm:$0xff]  }
  0x5e   :  { %971 = vmatpush3.bf16.msra.mxu0 %v1121_v21  ;;  %v1158_v9 = vld [vmem:[#allocation7 + $0x8] sm:$0xff]   ;;  %v1159_v10 = vld [vmem:[#allocation7 + $0x10] sm:$0xff]   ;;  %v1160_v11 = vld [vmem:[#allocation7 + $0x18] sm:$0xff]  }
  0x5f   :  { %972 = vmatprep.subr.bf16.mxu0 %v1124_v24  ;;  %v1161_v12 = vld [vmem:[#allocation7 + $0x20] sm:$0xff]   ;;  %v1162_v13 = vld [vmem:[#allocation7 + $0x28] sm:$0xff]   ;;  %v1163_v40 = vld [vmem:[#allocation7 + $0x30] sm:$0xff]  }
  0x60   :  { %993 = vmatpush3.bf16.msra.mxu1 %v1123_v23  ;;  %v891_v15 = vld [vmem:[%s1401_s2] ss:$0 sm:$0xff] }
  0x61   :  { %994 = vmatprep.subr.bf16.mxu1 %v1126_v26 }
  0x62   :  { %973 = vmatpush3.bf16.msra.mxu0 %v1125_v25 }
  0x63   :  { %974 = vmatprep.subr.bf16.mxu0 %v1128_v28 }
  0x64   :  { %995 = vmatpush3.bf16.msra.mxu1 %v1127_v27 }
  0x65   :  { %996 = vmatprep.subr.bf16.mxu1 %v1130_v30 }
  0x66   :  { %975 = vmatpush3.bf16.msra.mxu0 %v1129_v29 }
  0x67   :  { %1004 = vmatprep.subr.bf16.mxu0 %v1132_v36 }
  0x68   :  { %997 = vmatpush3.bf16.msra.mxu1 %v1131_v33 }
  0x69   :  { %530 = vmatmul.mubr.bf16.vlgmr.msra.gmra.mrb[0].mxu0 %v186_v35  ;;  %1046 = vmatprep.subr.bf16.mxu1 %v1265_v44 }
  0x6a   :  { %1005 = vmatpush3.bf16.msra.mxu0 %v1133_v39  ;;  %609 = vmatprep.mubr.bf16.mxu0 %v191_v56 }
  0x6b   :  { %570 = vmatmul.mubr.bf16.vlgmr.msra.gmra.mrb[0].mxu1 %v188_v41  ;;  %1006 = vmatprep.subr.bf16.mxu0 %v1134_v42  ;;  %v1164_v41 = vld [vmem:[#allocation7 + $0x38] sm:$0xff]   ;;  %v942_v42 = vld [vmem:[%s1403_s4] ss:$0 sm:$0xff] }
  0x6c   :  { %1048 = vmatprep.mubr.msk.bf16.mxu1 %vm1266_vm0, %v1265_v44  ;;  %1047 = vmatpush3.bf16.msra.mxu1 %v1148_v53 }
  0x6d   :  { %1052 = vmatprep.subr.bf16.mxu1 %v1265_v44 }
  0x6e   :  { %1007 = vmatpush3.bf16.msra.mxu0 %v1135_v43 }
  0x6f   :  { %1008 = vmatprep.subr.bf16.mxu0 %v1136_v45 }
  0x72   :  { %1009 = vmatpush3.bf16.msra.mxu0 %v1137_v46 }
  0x73   :  { %1010 = vmatprep.subr.bf16.mxu0 %v1138_v47  ;;  %1049 = vmatmul.mubr.msk.bf16.vlgmr.msra.gmra.mrb[4].mxu1 %vm493_vm1, %v192_v58 }
  0x74   :  { %1068 = vmatprep.mubr.msk.bf16.mxu1 %vm1266_vm0, %v1265_v44  ;;  %1053 = vmatpush3.bf16.msra.mxu1 %v1149_v0 }
  0x75   :  { %1054 = vmatprep.subr.bf16.mxu1 %v1265_v44 }
  0x76   :  { %1011 = vmatpush3.bf16.msra.mxu0 %v1139_v48 }
  0x77   :  { %1012 = vmatprep.subr.bf16.mxu0 %v1140_v49 }
  0x78   :  { %1055 = vmatpush3.bf16.msra.mxu1 %v1150_v1 }
  0x79   :  { %1056 = vmatprep.subr.bf16.mxu1 %v1265_v44 }
  0x7a   :  { %1013 = vmatpush3.bf16.msra.mxu0 %v1141_v50 }
  0x7b   :  { %1014 = vmatprep.subr.bf16.mxu0 %v1142_v51  ;;  %v951_v51 = vld [vmem:[%s1405_s6] ss:$0 sm:$0xff] }
  0x7c   :  { %1057 = vmatpush3.bf16.msra.mxu1 %v1151_v2 }
  0x7d   :  { %1058 = vmatprep.subr.bf16.mxu1 %v1265_v44 }
  0x7e   :  { %1015 = vmatpush3.bf16.msra.mxu0 %v1143_v52 }
  0x7f   :  { %1016 = vmatprep.subr.bf16.mxu0 %v1144_v55 }
  0x80   :  { %1059 = vmatpush3.bf16.msra.mxu1 %v1152_v3 }
  0x81   :  { %1060 = vmatprep.subr.bf16.mxu1 %v1265_v44 }
  0x82   :  { %1017 = vmatpush3.bf16.msra.mxu0 %v1145_v59 }
  0x83   :  { %1018 = vmatprep.subr.bf16.mxu0 %v1146_v60 }
  0x84   :  { %1061 = vmatpush3.bf16.msra.mxu1 %v1153_v4 }
  0x85   :  { %1062 = vmatprep.subr.bf16.mxu1 %v1265_v44 }
  0x86   :  { %1019 = vmatpush3.bf16.msra.mxu0 %v1147_v61 }
  0x87   :  { %1072 = vmatprep.subr.bf16.mxu0 %v1265_v44 }
  0x88   :  { %1063 = vmatpush3.bf16.msra.mxu1 %v1154_v5 }
  0x89   :  { %610 = vmatmul.mubr.bf16.vlgmr.msra.gmra.mrb[4].mxu0 %v190_v63  ;;  %1064 = vmatprep.subr.bf16.mxu1 %v1265_v44 }
  0x8a   :  { %1088 = vmatprep.mubr.msk.bf16.mxu0 %vm1266_vm0, %v1265_v44  ;;  %1073 = vmatpush3.bf16.msra.mxu0 %v1157_v8 }
  0x8b   :  { %1074 = vmatprep.subr.bf16.mxu0 %v1265_v44 }
  0x8c   :  { %1065 = vmatpush3.bf16.msra.mxu1 %v1155_v6 }
  0x8d   :  { %1066 = vmatprep.subr.bf16.mxu1 %v1265_v44 }
  0x8e   :  { %1075 = vmatpush3.bf16.msra.mxu0 %v1158_v9 }
  0x8f   :  { %1076 = vmatprep.subr.bf16.mxu0 %v1265_v44 }
  0x90   :  { %1067 = vmatpush3.bf16.msra.mxu1 %v1156_v7 }
  0x92   :  { %1077 = vmatpush3.bf16.msra.mxu0 %v1159_v10 }
  0x93   :  { %1078 = vmatprep.subr.bf16.mxu0 %v1265_v44 }
  0x96   :  { %1079 = vmatpush3.bf16.msra.mxu0 %v1160_v11 }
  0x97   :  { %1080 = vmatprep.subr.bf16.mxu0 %v1265_v44 }
  0x9a   :  { %1081 = vmatpush3.bf16.msra.mxu0 %v1161_v12 }
  0x9b   :  { %1082 = vmatprep.subr.bf16.mxu0 %v1265_v44 }
  0x9e   :  { %1083 = vmatpush3.bf16.msra.mxu0 %v1162_v13 }
  0x9f   :  { %1084 = vmatprep.subr.bf16.mxu0 %v1265_v44 }
  0xa2   :  { %1085 = vmatpush3.bf16.msra.mxu0 %v1163_v40 }
  0xa3   :  { %1086 = vmatprep.subr.bf16.mxu0 %v1265_v44 }
  0xa6   :  { %1087 = vmatpush3.bf16.msra.mxu0 %v1164_v41 }
 0x13c   :  { %v976_v14 = vpop.f32.mrb[0].mxu0 }
 0x13d   :  { %v977_v16 = vpop.f32.mrb[1].mxu0 }
 0x13e   :  { %v978_v17 = vadd.f32 %v977_v16, %v976_v14  ;;  %v979_v18 = vpop.f32.mrb[2].mxu0  ;;  %v998_v19 = vpop.f32.mrb[0].mxu1 }
 0x13f   :  { %v980_v20 = vpop.f32.mrb[3].mxu0  ;;  %v999_v22 = vpop.f32.mrb[1].mxu1 }
 0x140   :  { %v532_v21 = vadd.f32 %v978_v17, %v891_v15  ;;  %v1000_v23 = vadd.f32 %v999_v22, %v998_v19  ;;  %v1001_v24 = vpop.f32.mrb[2].mxu1 }
 0x141   :  { %v1002_v25 = vpop.f32.mrb[3].mxu1 }
 0x142   :  { %v572_v26 = vadd.f32 %v1000_v23, %v532_v21 }
 0x146   :  { %v651_v27 = vpop.f32.mrb[4].mxu1 }
 0x147   :  { %v1050_v28 = vpop.f32.mrb[5].mxu1 }
 0x148   :  { %v654_v29 = vpop.f32.mrb[6].mxu1 }
 0x149   :  { %v1051_v30 = vpop.f32.mrb[7].mxu1 }
 0x15c   :  { %v1020_v31 = vpop.f32.mrb[4].mxu0 }
 0x15d   :  { %v1021_v32 = vpop.f32.mrb[5].mxu0 }
 0x15e   :  { %v1022_v33 = vadd.f32 %v1021_v32, %v1020_v31  ;;  %v1023_v34 = vpop.f32.mrb[6].mxu0 }
 0x15f   :  { %v1024_v35 = vpop.f32.mrb[7].mxu0 }
 0x160   :  { %v612_v36 = vadd.f32 %v1022_v33, %v572_v26 }
 0x162   :  { %v652_v37 = vadd.f32 %v651_v27, %v612_v36 }
 0x164   :  { %v657_v38 = vmax.f32 %v652_v37, 0.0 }
 0x166   :  { %v675_v39 = vpack.c.bf16 %v657_v38, %v657_v38 }
 0x168   :  { %1069 = vmatmul.mubr.bf16.vlgmr.msra.gmra.mrb[8].mxu1 %v675_v39 }
 0x23b   :  { %v764_v43 = vpop.f32.mrb[8].mxu1 }
 0x23c   :  { %v765_v45 = vadd.f32 %v942_v42, %v764_v43  ;;  %v1070_v46 = vpop.f32.mrb[9].mxu1 }
 0x23d   :  { %v767_v47 = vpop.f32.mrb[10].mxu1 }
 0x23e   :  { %v770_v48 = vmax.f32 %v765_v45, 0.0  ;;  %v1071_v49 = vpop.f32.mrb[11].mxu1 }
 0x240   :  { %v788_v50 = vpack.c.bf16 %v770_v48, %v770_v48 }
 0x242   :  { %1089 = vmatmul.mubr.bf16.vlgmr.msra.gmra.mrb[8].mxu0 %v788_v50 }
 0x315   :  { %v877_v52 = vpop.f32.mrb[8].mxu0 }
 0x316   :  { %v878_v44 = vadd.f32 %v951_v51, %v877_v52  ;;  %v1090_v53 = vpop.f32.mrb[9].mxu0 }
 0x317   :  { %v880_v54 = vpop.f32.mrb[10].mxu0 }
 0x318   :  { %883 = vst [vmem:[%s1406_s7] sm:$0xff] %v878_v44  ;;  %v1091_v55 = vpop.f32.mrb[11].mxu0 }
 0x319   :  { %888 = vsyncpa [#allocation3], 1 }
 0x31a   :  { %889 = vsyncpa [#allocation5], 1 }
 0x31b   :  { %890 = vsyncpa [#allocation8], 1 }

</bundles_post_ra>
